<compile_context>
chip_gen: v7x
topology: tpu7x:2x2x1
jax: 0.10.0
libtpu: 0.0.40
codegen_flags: <defaults>
</compile_context>

<pallas_src>
import functools
import math

import jax
import jax.numpy as jnp
from jax.experimental import pallas as pl
from jax.experimental.pallas import tpu as pltpu

_EPS_NORM = 1e-12                                  # min ||.|| clamp (avoid 0-division)
_EPS_TANH = 1e-7                                   # artanh argument clamp
_ARTANH_MAX = float(math.atanh(1.0 - _EPS_TANH))   # artanh(clip(tanh(r))) == min(r, MAX)


def _round_up(n, m):
    return ((n + m - 1) // m) * m


# ---------------------------------------------------------------------------
# in-kernel math helpers (f32)
# ---------------------------------------------------------------------------
def _artanh(z):
    z = jnp.clip(z, -1.0 + _EPS_TANH, 1.0 - _EPS_TANH)
    return 0.5 * (jnp.log1p(z) - jnp.log1p(-z))


def _row_r(x, sqrt_c):
    # r = sqrt(c) * max(||x||, eps) per row -> shape [rows, 1]
    sumsq = jnp.sum(x * x, axis=-1, keepdims=True)
    return sqrt_c * jnp.sqrt(jnp.maximum(sumsq, _EPS_NORM * _EPS_NORM))


# ---------------------------------------------------------------------------
# kernel
# ---------------------------------------------------------------------------
def _hyper_ffn_kernel(x_ref, w1_ref, b1_ref, w2_ref, b2_ref, o_ref,
                      xeuc_ref, acc_y_ref, acc_sq_ref, *, curvature):
    sqrt_c = jnp.float32(curvature ** 0.5)
    f = pl.program_id(1)

    # --- init (first d_ff tile of this row tile): logmap0(x) + zero accumulators.
    @pl.when(f == 0)
    def _():
        x = x_ref[...].astype(jnp.float32)
        r = _row_r(x, sqrt_c)
        scale = _artanh(r) * pl.reciprocal(r, approx=True)
        xeuc_ref[...] = (scale * x).astype(xeuc_ref.dtype)        # bf16 MXU operand
        acc_y_ref[...] = jnp.zeros_like(acc_y_ref)
        acc_sq_ref[...] = jnp.zeros_like(acc_sq_ref)

    # --- linear1 + ReLU over this d_ff tile (bf16 operands, f32 accumulate).
    h = jnp.dot(xeuc_ref[...], w1_ref[...], preferred_element_type=jnp.float32)
    h = jnp.maximum(h + b1_ref[...], 0.0)

    # --- accumulate ||h||^2 (for the fused expmap0->logmap0 scale) and h @ W2.
    # The log0(exp0(h)) scale is a per-row scalar and matmul2 is linear in h, so
    # the scale can be applied to the accumulated product after the d_ff sweep.
    acc_sq_ref[...] += jnp.sum(h * h, axis=-1, keepdims=True)
    acc_y_ref[...] += jnp.dot(h.astype(jnp.bfloat16), w2_ref[...],
                              preferred_element_type=jnp.float32)

    # --- finalize (last d_ff tile): apply round-trip scale, bias, final expmap0.
    @pl.when(f == pl.num_programs(1) - 1)
    def _():
        r_h = sqrt_c * jnp.sqrt(jnp.maximum(acc_sq_ref[...], _EPS_NORM * _EPS_NORM))
        # logmap0(expmap0(h)) == (artanh(clip(tanh(r)))/r)*h == (min(r, MAX)/r)*h
        scale_h = jnp.minimum(r_h, _ARTANH_MAX) * pl.reciprocal(r_h, approx=True)
        y = scale_h * acc_y_ref[...] + b2_ref[...]
        r_y = _row_r(y, sqrt_c)
        scale_y = jnp.tanh(r_y) * pl.reciprocal(r_y, approx=True)   # expmap0
        o_ref[...] = (scale_y * y).astype(o_ref.dtype)


# ---------------------------------------------------------------------------
# tiling / VMEM budgeting
# ---------------------------------------------------------------------------
def _vmem_capacity_bytes():
    try:
        info = pltpu.get_tpu_info()
        cap = getattr(info, "vmem_capacity_bytes", None)
        if cap:
            return int(cap)
    except Exception:
        pass
    return 64 * 1024 * 1024   # conservative default (v7x per-core VMEM)


def _choose_tiles(rows, D, F, x_bytes, out_bytes, vmem_budget):
    def weight_bytes(ft):
        # bf16 W1/W2 tiles (double-buffered) + f32 bias tiles (double-buffered)
        return 2 * (2 * D * ft * 2) + 2 * (ft + D) * 4

    # d_ff tile: keep the weights fully resident when they fit; otherwise halve
    # F (staying a multiple of 128 for the lane dim) until the tiles fit ~40%
    # of the budget and stream them along a second grid axis.
    f_tile = F
    weight_budget = max(int(0.4 * vmem_budget), 1)
    while weight_bytes(f_tile) > weight_budget and f_tile % 256 == 0:
        f_tile //= 2
    # TODO(synk): if F has no 128-aligned divisor small enough (non power-of-two
    #             d_ff with huge d_model), the weights stay resident and may still
    #             exceed VMEM on v7x; tiling D as well would be needed then.

    def act_bytes(rt):
        io = 2 * rt * D * (x_bytes + out_bytes)        # x/out tiles, double-buffered
        scratch = rt * D * (2 + 4) + rt * 128 * 4      # xeuc(bf16)+acc_y(f32)+acc_sq(padded)
        interm = 2 * rt * f_tile * 4                   # h (f32) + elementwise temps
        return io + scratch + interm

    # keep >=2 grid steps along rows when rows permit (megacore / v7x 2 TCs)
    max_row_tile = max(8, _round_up((rows + 1) // 2, 8))
    row_tile = 8
    for rt in (1024, 512, 256, 128, 64, 32, 16, 8):
        rt = min(rt, max_row_tile)
        if weight_bytes(f_tile) + act_bytes(rt) <= vmem_budget:
            row_tile = rt
            break

    footprint = weight_bytes(f_tile) + act_bytes(row_tile)
    return row_tile, f_tile, footprint


# ---------------------------------------------------------------------------
# wrapper
# ---------------------------------------------------------------------------
def hyperbolic_feed_forward(x, w1, b1, w2, b2, *, curvature=1.0, out_dtype=None):
    """x: [B, S, D]; w1: [D, F]; b1: [F]; w2: [F, D]; b2: [D]."""
    B, S, D = x.shape
    F = w1.shape[1]
    rows = B * S
    out_dtype = x.dtype if out_dtype is None else jnp.dtype(out_dtype)

    # No pad / no f32 cast: reshape only, native dtype; upcast happens in-kernel.
    x2d = x.reshape(rows, D)

    # No-op if the caller already stored the weights in bf16 (recommended).
    w1_bf = w1.astype(jnp.bfloat16)
    w2_bf = w2.astype(jnp.bfloat16)
    b1_2d = b1.reshape(1, F).astype(jnp.float32)
    b2_2d = b2.reshape(1, D).astype(jnp.float32)

    vmem_cap = _vmem_capacity_bytes()
    vmem_budget = min(int(0.70 * vmem_cap), 96 * 1024 * 1024)
    row_tile, f_tile, footprint = _choose_tiles(
        rows, D, F, x2d.dtype.itemsize, jnp.dtype(out_dtype).itemsize, vmem_budget)

    grid = (pl.cdiv(rows, row_tile), F // f_tile)
    vmem_limit = min(max(int(1.25 * footprint), 32 * 1024 * 1024),
                     int(0.85 * vmem_cap))

    kernel = functools.partial(_hyper_ffn_kernel, curvature=float(curvature))

    out2d = pl.pallas_call(
        kernel,
        out_shape=jax.ShapeDtypeStruct((rows, D), out_dtype),
        grid_spec=pltpu.PrefetchScalarGridSpec(
            num_scalar_prefetch=0,
            grid=grid,
            in_specs=[
                pl.BlockSpec((row_tile, D), lambda i, f: (i, 0)),   # x rows tile
                pl.BlockSpec((D, f_tile), lambda i, f: (0, f)),     # W1 (bf16)
                pl.BlockSpec((1, f_tile), lambda i, f: (0, f)),     # b1
                pl.BlockSpec((f_tile, D), lambda i, f: (f, 0)),     # W2 (bf16)
                pl.BlockSpec((1, D), lambda i, f: (0, 0)),          # b2
            ],
            out_specs=pl.BlockSpec((row_tile, D), lambda i, f: (i, 0)),
            scratch_shapes=[
                pltpu.VMEM((row_tile, D), jnp.bfloat16),   # x_euc (matmul1 operand)
                pltpu.VMEM((row_tile, D), jnp.float32),    # acc_y  = h @ W2
                pltpu.VMEM((row_tile, 1), jnp.float32),    # acc_sq = ||h||^2
            ]),
        compiler_params=pltpu.CompilerParams(
            dimension_semantics=("parallel", "arbitrary"),
            vmem_limit_bytes=vmem_limit),
    )(x2d, w1_bf, b1_2d, w2_bf, b2_2d)

    return out2d.reshape(B, S, D)


# ---------------------------------------------------------------------------
# pure-JAX f32 reference (unfused, step for step like the PyTorch module)
# ---------------------------------------------------------------------------
def _ref_artanh(z):
    z = jnp.clip(z, -1.0 + _EPS_TANH, 1.0 - _EPS_TANH)
    return 0.5 * (jnp.log1p(z) - jnp.log1p(-z))


def _ref_logmap0(x, sqrt_c):
    r = _row_r(x, sqrt_c)
    return (_ref_artanh(r) / r) * x


def _ref_expmap0(u, sqrt_c):
    r = _row_r(u, sqrt_c)
    return (jnp.tanh(r) / r) * u


def _reference(x, w1, b1, w2, b2, c=1.0):
    sqrt_c = jnp.float32(c) ** 0.5
    x_euc = _ref_logmap0(x, sqrt_c)
    h = jnp.maximum(x_euc @ w1 + b1, 0.0)
    h = _ref_logmap0(_ref_expmap0(h, sqrt_c), sqrt_c)
    y = h @ w2 + b2
    return _ref_expmap0(y, sqrt_c)


if __name__ == "__main__":
    B, S, D_MODEL, D_FF = 2, 8, 128, 256

    key = jax.random.PRNGKey(0)
    kx, k1, kb1, k2, kb2 = jax.random.split(key, 5)

    # Input must lie in the Poincare ball (norm < 1) -> small scale.
    x = 0.05 * jax.random.normal(kx, (B, S, D_MODEL), dtype=jnp.float32)

    # PyTorch-Linear-style init: U(-1/sqrt(fan_in), 1/sqrt(fan_in)).
    lim1 = 1.0 / (D_MODEL ** 0.5)
    lim2 = 1.0 / (D_FF ** 0.5)
    w1 = jax.random.uniform(k1, (D_MODEL, D_FF), jnp.float32, -lim1, lim1)
    b1 = jax.random.uniform(kb1, (D_FF,), jnp.float32, -lim1, lim1)
    w2 = jax.random.uniform(k2, (D_FF, D_MODEL), jnp.float32, -lim2, lim2)
    b2 = jax.random.uniform(kb2, (D_MODEL,), jnp.float32, -lim2, lim2)

    # Cast weights to bf16 once at "parameter load" time (not per call).
    w1_bf = w1.astype(jnp.bfloat16)
    w2_bf = w2.astype(jnp.bfloat16)

    out = hyperbolic_feed_forward(x, w1_bf, b1, w2_bf, b2, curvature=1.0)
    out = jax.block_until_ready(out)

    ref = _reference(x, w1, b1, w2, b2, 1.0)
    assert out.shape == (B, S, D_MODEL)
    max_err = float(jnp.max(jnp.abs(out - ref)))
    # bf16 matmul operands + approx EUP reciprocal vs f32 reference -> loose tol.
    assert jnp.allclose(out, ref, atol=2e-2, rtol=2e-2), (
        f"mismatch vs reference, max|diff|={max_err}")

    print("KERNEL_OK")
</pallas_src>

<mosaic_0001>
module attributes {stable_mosaic.version = 11 : i64} {
  func.func @_hyper_ffn_kernel(%arg0: i32, %arg1: i32, %arg2: memref<8x128xf32, #tpu.memory_space<vmem>>, %arg3: memref<128x256xbf16, #tpu.memory_space<vmem>>, %arg4: memref<1x256xf32, #tpu.memory_space<vmem>>, %arg5: memref<256x128xbf16, #tpu.memory_space<vmem>>, %arg6: memref<1x128xf32, #tpu.memory_space<vmem>>, %arg7: memref<8x128xf32, #tpu.memory_space<vmem>>, %arg8: memref<8x128xbf16, #tpu.memory_space<vmem>>, %arg9: memref<8x128xf32, #tpu.memory_space<vmem>>, %arg10: memref<8x1xf32, #tpu.memory_space<vmem>>) attributes {dimension_semantics = [#tpu.dimension_semantics<parallel>, #tpu.dimension_semantics<arbitrary>], iteration_bounds = array<i64: 2, 1>, scalar_prefetch = 0 : i64, scratch_operands = 3 : i64, tpu.core_type = #tpu.core_type<tc>, window_params = [{transform_indices = @transform_0, window_bounds = array<i64: 8, 128>}, {transform_indices = @transform_1, window_bounds = array<i64: 128, 256>}, {transform_indices = @transform_2, window_bounds = array<i64: 1, 256>}, {transform_indices = @transform_3, window_bounds = array<i64: 256, 128>}, {pipeline_mode = #tpu.pipeline_mode<synchronous>, transform_indices = @transform_4, window_bounds = array<i64: 1, 128>}, {transform_indices = @transform_5, window_bounds = array<i64: 8, 128>}]} {
    %c0_i32 = arith.constant 0 : i32
    %0 = arith.cmpi eq, %arg1, %c0_i32 : i32
    %1 = arith.extui %0 : i1 to i32
    %cst = arith.constant 1.000000e+00 : f32
    %c0_i32_0 = arith.constant 0 : i32
    %2 = arith.cmpi ne, %1, %c0_i32_0 : i32
    scf.if %2 {
      %c0_23 = arith.constant 0 : index
      %c0_24 = arith.constant 0 : index
      %26 = vector.load %arg2[%c0_23, %c0_24] : memref<8x128xf32, #tpu.memory_space<vmem>>, vector<8x128xf32>
      %27 = arith.mulf %26, %26 : vector<8x128xf32>
      %cst_25 = arith.constant dense<0.000000e+00> : vector<8xf32>
      %28 = vector.multi_reduction <add>, %27, %cst_25 [1] : vector<8x128xf32> to vector<8xf32>
      %29 = vector.shape_cast %28 : vector<8xf32> to vector<8x1xf32>
      %cst_26 = arith.constant 1.000000e-24 : f32
      %30 = vector.broadcast %cst_26 : f32 to vector<8x1xf32>
      %31 = arith.maximumf %29, %30 : vector<8x1xf32>
      %32 = math.sqrt %31 : vector<8x1xf32>
      %33 = vector.broadcast %cst : f32 to vector<8x1xf32>
      %34 = arith.mulf %33, %32 : vector<8x1xf32>
      %cst_27 = arith.constant -0.99999988 : f32
      %cst_28 = arith.constant 0.99999988 : f32
      %35 = vector.broadcast %cst_27 : f32 to vector<8x1xf32>
      %36 = arith.maximumf %35, %34 : vector<8x1xf32>
      %37 = vector.broadcast %cst_28 : f32 to vector<8x1xf32>
      %38 = arith.minimumf %37, %36 : vector<8x1xf32>
      %39 = math.log1p %38 : vector<8x1xf32>
      %cst_29 = arith.constant 0.000000e+00 : f32
      %40 = vector.broadcast %cst_29 : f32 to vector<8x1xf32>
      %41 = arith.subf %40, %38 : vector<8x1xf32>
      %42 = math.log1p %41 : vector<8x1xf32>
      %43 = arith.subf %39, %42 : vector<8x1xf32>
      %cst_30 = arith.constant 5.000000e-01 : f32
      %44 = vector.broadcast %cst_30 : f32 to vector<8x1xf32>
      %45 = arith.mulf %44, %43 : vector<8x1xf32>
      %46 = tpu.reciprocal %34 {approx = true} : vector<8x1xf32> -> vector<8x1xf32>
      %47 = arith.mulf %45, %46 : vector<8x1xf32>
      %48 = vector.broadcast %47 : vector<8x1xf32> to vector<8x128xf32>
      %49 = arith.mulf %48, %26 : vector<8x128xf32>
      %50 = arith.truncf %49 : vector<8x128xf32> to vector<8x128xbf16>
      %c0_31 = arith.constant 0 : index
      %c0_32 = arith.constant 0 : index
      %51 = vector.load %arg8[%c0_31, %c0_32] : memref<8x128xbf16, #tpu.memory_space<vmem>>, vector<8x128xbf16>
      tpu.vector_store %arg8[%c0_31, %c0_32], %50 {strides = array<i32>} : memref<8x128xbf16, #tpu.memory_space<vmem>>, vector<8x128xbf16>,
      %cst_33 = arith.constant 0.000000e+00 : f32
      %52 = vector.broadcast %cst_33 : f32 to vector<8x128xf32>
      %c0_34 = arith.constant 0 : index
      %c0_35 = arith.constant 0 : index
      %53 = vector.load %arg9[%c0_34, %c0_35] : memref<8x128xf32, #tpu.memory_space<vmem>>, vector<8x128xf32>
      tpu.vector_store %arg9[%c0_34, %c0_35], %52 {strides = array<i32>} : memref<8x128xf32, #tpu.memory_space<vmem>>, vector<8x128xf32>,
      %cst_36 = arith.constant 0.000000e+00 : f32
      %54 = vector.broadcast %cst_36 : f32 to vector<8x1xf32>
      %c0_37 = arith.constant 0 : index
      %c0_38 = arith.constant 0 : index
      %55 = vector.load %arg10[%c0_37, %c0_38] : memref<8x1xf32, #tpu.memory_space<vmem>>, vector<8x1xf32>
      tpu.vector_store %arg10[%c0_37, %c0_38], %54 {strides = array<i32>} : memref<8x1xf32, #tpu.memory_space<vmem>>, vector<8x1xf32>,
    } else {
    }
    %c0 = arith.constant 0 : index
    %c0_1 = arith.constant 0 : index
    %3 = vector.load %arg8[%c0, %c0_1] : memref<8x128xbf16, #tpu.memory_space<vmem>>, vector<8x128xbf16>
    %c0_2 = arith.constant 0 : index
    %c0_3 = arith.constant 0 : index
    %4 = vector.load %arg3[%c0_2, %c0_3] : memref<128x256xbf16, #tpu.memory_space<vmem>>, vector<128x256xbf16>
    %cst_4 = arith.constant dense<0.000000e+00> : vector<8x256xf32>
    %5 = tpu.matmul %3, %4, %cst_4 {dimension_numbers = #tpu.dot_dimension_numbers<[1], [0], [0], [1], [0, 0, 1, 1], [], []>} : vector<8x128xbf16>, vector<128x256xbf16>, vector<8x256xf32> -> vector<8x256xf32>
    %c0_5 = arith.constant 0 : index
    %c0_6 = arith.constant 0 : index
    %6 = vector.load %arg4[%c0_5, %c0_6] : memref<1x256xf32, #tpu.memory_space<vmem>>, vector<1x256xf32>
    %7 = vector.broadcast %6 : vector<1x256xf32> to vector<8x256xf32>
    %8 = arith.addf %5, %7 : vector<8x256xf32>
    %cst_7 = arith.constant 0.000000e+00 : f32
    %9 = vector.broadcast %cst_7 : f32 to vector<8x256xf32>
    %10 = arith.maximumf %8, %9 : vector<8x256xf32>
    %c0_8 = arith.constant 0 : index
    %c0_9 = arith.constant 0 : index
    %11 = vector.load %arg10[%c0_8, %c0_9] : memref<8x1xf32, #tpu.memory_space<vmem>>, vector<8x1xf32>
    %12 = arith.mulf %10, %10 : vector<8x256xf32>
    %cst_10 = arith.constant dense<0.000000e+00> : vector<8xf32>
    %13 = vector.multi_reduction <add>, %12, %cst_10 [1] : vector<8x256xf32> to vector<8xf32>
    %14 = vector.shape_cast %13 : vector<8xf32> to vector<8x1xf32>
    %15 = arith.addf %11, %14 : vector<8x1xf32>
    %c0_11 = arith.constant 0 : index
    %c0_12 = arith.constant 0 : index
    %16 = vector.load %arg10[%c0_11, %c0_12] : memref<8x1xf32, #tpu.memory_space<vmem>>, vector<8x1xf32>
    tpu.vector_store %arg10[%c0_11, %c0_12], %15 {strides = array<i32>} : memref<8x1xf32, #tpu.memory_space<vmem>>, vector<8x1xf32>,
    %c0_13 = arith.constant 0 : index
    %c0_14 = arith.constant 0 : index
    %17 = vector.load %arg9[%c0_13, %c0_14] : memref<8x128xf32, #tpu.memory_space<vmem>>, vector<8x128xf32>
    %18 = arith.truncf %10 : vector<8x256xf32> to vector<8x256xbf16>
    %c0_15 = arith.constant 0 : index
    %c0_16 = arith.constant 0 : index
    %19 = vector.load %arg5[%c0_15, %c0_16] : memref<256x128xbf16, #tpu.memory_space<vmem>>, vector<256x128xbf16>
    %cst_17 = arith.constant dense<0.000000e+00> : vector<8x128xf32>
    %20 = tpu.matmul %18, %19, %cst_17 {dimension_numbers = #tpu.dot_dimension_numbers<[1], [0], [0], [1], [0, 0, 1, 1], [], []>} : vector<8x256xbf16>, vector<256x128xbf16>, vector<8x128xf32> -> vector<8x128xf32>
    %21 = arith.addf %17, %20 : vector<8x128xf32>
    %c0_18 = arith.constant 0 : index
    %c0_19 = arith.constant 0 : index
    %22 = vector.load %arg9[%c0_18, %c0_19] : memref<8x128xf32, #tpu.memory_space<vmem>>, vector<8x128xf32>
    tpu.vector_store %arg9[%c0_18, %c0_19], %21 {strides = array<i32>} : memref<8x128xf32, #tpu.memory_space<vmem>>, vector<8x128xf32>,
    %c0_i32_20 = arith.constant 0 : i32
    %23 = arith.cmpi eq, %arg1, %c0_i32_20 : i32
    %24 = arith.extui %23 : i1 to i32
    %cst_21 = arith.constant 1.000000e+00 : f32
    %c0_i32_22 = arith.constant 0 : i32
    %25 = arith.cmpi ne, %24, %c0_i32_22 : i32
    scf.if %25 {
      %c0_23 = arith.constant 0 : index
      %c0_24 = arith.constant 0 : index
      %26 = vector.load %arg10[%c0_23, %c0_24] : memref<8x1xf32, #tpu.memory_space<vmem>>, vector<8x1xf32>
      %cst_25 = arith.constant 1.000000e-24 : f32
      %27 = vector.broadcast %cst_25 : f32 to vector<8x1xf32>
      %28 = arith.maximumf %26, %27 : vector<8x1xf32>
      %29 = math.sqrt %28 : vector<8x1xf32>
      %30 = vector.broadcast %cst_21 : f32 to vector<8x1xf32>
      %31 = arith.mulf %30, %29 : vector<8x1xf32>
      %cst_26 = arith.constant 8.40562152 : f32
      %32 = vector.broadcast %cst_26 : f32 to vector<8x1xf32>
      %33 = arith.minimumf %31, %32 : vector<8x1xf32>
      %34 = tpu.reciprocal %31 {approx = true} : vector<8x1xf32> -> vector<8x1xf32>
      %35 = arith.mulf %33, %34 : vector<8x1xf32>
      %c0_27 = arith.constant 0 : index
      %c0_28 = arith.constant 0 : index
      %36 = vector.load %arg9[%c0_27, %c0_28] : memref<8x128xf32, #tpu.memory_space<vmem>>, vector<8x128xf32>
      %37 = vector.broadcast %35 : vector<8x1xf32> to vector<8x128xf32>
      %38 = arith.mulf %37, %36 : vector<8x128xf32>
      %c0_29 = arith.constant 0 : index
      %c0_30 = arith.constant 0 : index
      %39 = vector.load %arg6[%c0_29, %c0_30] : memref<1x128xf32, #tpu.memory_space<vmem>>, vector<1x128xf32>
      %40 = vector.broadcast %39 : vector<1x128xf32> to vector<8x128xf32>
      %41 = arith.addf %38, %40 : vector<8x128xf32>
      %42 = arith.mulf %41, %41 : vector<8x128xf32>
      %cst_31 = arith.constant dense<0.000000e+00> : vector<8xf32>
      %43 = vector.multi_reduction <add>, %42, %cst_31 [1] : vector<8x128xf32> to vector<8xf32>
      %44 = vector.shape_cast %43 : vector<8xf32> to vector<8x1xf32>
      %cst_32 = arith.constant 1.000000e-24 : f32
      %45 = vector.broadcast %cst_32 : f32 to vector<8x1xf32>
      %46 = arith.maximumf %44, %45 : vector<8x1xf32>
      %47 = math.sqrt %46 : vector<8x1xf32>
      %48 = vector.broadcast %cst_21 : f32 to vector<8x1xf32>
      %49 = arith.mulf %48, %47 : vector<8x1xf32>
      %50 = math.tanh %49 : vector<8x1xf32>
      %51 = tpu.reciprocal %49 {approx = true} : vector<8x1xf32> -> vector<8x1xf32>
      %52 = arith.mulf %50, %51 : vector<8x1xf32>
      %53 = vector.broadcast %52 : vector<8x1xf32> to vector<8x128xf32>
      %54 = arith.mulf %53, %41 : vector<8x128xf32>
      %c0_33 = arith.constant 0 : index
      %c0_34 = arith.constant 0 : index
      %55 = vector.load %arg7[%c0_33, %c0_34] : memref<8x128xf32, #tpu.memory_space<vmem>>, vector<8x128xf32>
      tpu.vector_store %arg7[%c0_33, %c0_34], %54 {strides = array<i32>} : memref<8x128xf32, #tpu.memory_space<vmem>>, vector<8x128xf32>,
    } else {
    }
    return
  }
  func.func @transform_0(%arg0: i32, %arg1: i32) -> (i32, i32) {
    %c0_i32 = arith.constant 0 : i32
    %c0_i32_0 = arith.constant 0 : i32
    return %arg0, %c0_i32 : i32, i32
  }
  func.func @transform_1(%arg0: i32, %arg1: i32) -> (i32, i32) {
    %c0_i32 = arith.constant 0 : i32
    %c0_i32_0 = arith.constant 0 : i32
    return %c0_i32, %arg1 : i32, i32
  }
  func.func @transform_2(%arg0: i32, %arg1: i32) -> (i32, i32) {
    %c0_i32 = arith.constant 0 : i32
    %c0_i32_0 = arith.constant 0 : i32
    return %c0_i32, %arg1 : i32, i32
  }
  func.func @transform_3(%arg0: i32, %arg1: i32) -> (i32, i32) {
    %c0_i32 = arith.constant 0 : i32
    %c0_i32_0 = arith.constant 0 : i32
    return %arg1, %c0_i32 : i32, i32
  }
  func.func @transform_4(%arg0: i32, %arg1: i32) -> (i32, i32) {
    %c0_i32 = arith.constant 0 : i32
    %c0_i32_0 = arith.constant 0 : i32
    %c0_i32_1 = arith.constant 0 : i32
    return %c0_i32, %c0_i32_0 : i32, i32
  }
  func.func @transform_5(%arg0: i32, %arg1: i32) -> (i32, i32) {
    %c0_i32 = arith.constant 0 : i32
    %c0_i32_0 = arith.constant 0 : i32
    return %arg0, %c0_i32 : i32, i32
  }
}

</mosaic_0001>

<bundles_post_ra>
// kernel: tpu_custom_call.1
= control target key start
LH: loop header
LB: loop body
LE: loop exit
PB: predicated region body
PF: predicated region fallthrough
CT: control target
= control target key end

     0   :  { %10 = vsyncpa [#allocation6], 0  ;;  %s1577_s0 = inlined_call_operand.hbm [shape: f32[16,128], index: 0, kind: input, shape index: {}]   ;;  %s1578_s1 = inlined_call_operand.hbm [shape: bf16[128,256], index: 1, kind: input, shape index: {}]   ;;  %s1579_s2 = inlined_call_operand.vmem [shape: f32[1,256], index: 2, kind: input, shape index: {}]   ;;  %s1580_s3 = inlined_call_operand.hbm [shape: bf16[256,128], index: 3, kind: input, shape index: {}]   ;;  %s1581_s4 = inlined_call_operand.vmem [shape: f32[1,128], index: 4, kind: input, shape index: {}]   ;;  %s1582_s5 = inlined_call_operand.hbm [shape: f32[16,128], index: 5, kind: output, shape index: {}]  }
   0x1   :  { %12 = vsyncpa [#allocation6 + $0x1], 0 }
   0x2   :  { %13 = vsyncpa [#allocation9], 0 }
   0x3   :  { %14 = vsyncpa [#allocation7], 0 }
   0x4   :  { %16 = vsyncpa [#allocation7 + $0x1], 0  ;;  %s1310_s18 = smov 0   ;;  %s1312_s19 = smov 0  }
   0x5   :  { %s1314_s20 = smov 0   ;;  %s1316_s21 = smov 0  }
   0x6   :  { %s1318_s22 = smov 0   ;;  %s1320_s23 = smov 0  }
   0x7 LB: > { %s873_s24 = sadd.s32 4294967295, %s1268_s23   ;;  %s874_s25 = sadd.s32 4294967294, %s1268_s23   ;;  %s1268_s23 = sphi %s1320_s23, %s22_s23   ;;  %s1264_s22 = sphi %s1318_s22, %s1604_s22   ;;  %s1260_s21 = sphi %s1316_s21, %s1603_s21   ;;  %s1256_s20 = sphi %s1314_s20, %s1602_s20   ;;  %s1252_s19 = sphi %s1312_s19, %s1601_s19   ;;  %s1248_s18 = sphi %s1310_s18, %s1600_s18  }
   0x8   : > { %p54_p0 = scmp.ne.s32.totalorder %s1252_s19, %s1248_s18  ;;  %p1344_p1 = scmp.eq.s32.totalorder %s873_s24, 0 }
   0x9   : > { %p1348_p2 = scmp.eq.s32.totalorder %s873_s24, 1  ;;  %p183_p3 = scmp.eq.s32.totalorder %s874_s25, 1 }
   0xa   : > { %s1587_s26 = scalar_select %p1344_p1, 1, 0 }
   0xb   : > { %p1354_p4 = por %p1344_p1, %p54_p0  ;;  %p875_p5 = scmp.ge.s32.totalorder %s1268_s23, 1 }
   0xc   : > { %p1359_p6 = por %p183_p3, %p54_p0  ;;  %p190_p7 = scmp.lt.s32.totalorder %s1268_s23, 3 }
   0xd   : > { %s1589_s28 = scalar_select %p1354_p4, 1, 0 }
   0xe   : > { %s1590_s29 = scalar_select %p1359_p6, 1, 0 }
   0xf   : > { %p1364_p8 = pnand %p875_p5, %p190_p7  ;;  %s1270_s6 = smov [#allocation8]  }
  0x10   : > { %s205_s7 = sshll.u32 %s1270_s6, 4  ;;  %s1271_s9 = smov [#allocation10]   ;;  %s1368_s7 = int_to_ptr.vmem [resolvable:$true] %s205_s7 }
  0x11   : > { %p959_p9 = pneg %p1364_p8  ;;  %s229_s10 = sshll.u32 %s1271_s9, 4  ;;  %s1379_s10 = int_to_ptr.vmem [resolvable:$true] %s229_s10 }
  0x12   : > { %s1096_s13 = scalar_lea.hbm %s1578_s1, 2048 }
  0x13   : > { %p1375_p11 = pnand %p959_p9, %p1344_p1  ;;  %p1097_p12 = scmp.ne.s32.totalorder %s1578_s1, %s1096_s13 }
  0x14   : > { %p1103_p5 = scmp.lt.u32.totalorder %s1096_s13, %s1578_s1 }
  0x15   : > { %p1098_p13 = pneg %p1375_p11 }
  0x17   : > { %p1099_p0 = pnand %p1098_p13, %p1097_p12 }
  0x19   : > { %p1100_p3 = pneg %p1099_p0 }
  0x1b   : > { %p1105_p7 = pnand %p1103_p5, %p1100_p3 }
  0x1d   : > { %1108 = shalt.err (!%p1105_p7)
}
  0x1e   : > { %s1109_s24 = scalar_lea.vmem %s1368_s7, 2048  ;;  %p1117_p1 = scmp.lt.s32.totalorder %s1368_s7, %s1368_s7 }
  0x1f   : > { %p1110_p9 = scmp.ne.s32.totalorder %s1368_s7, %s1109_s24  ;;  %p1118_p12 = scmp.lt.s32.totalorder %s1109_s24, %s1109_s24 }
  0x21   : > { %p1112_p10 = pnand %p1110_p9, %p1098_p13  ;;  %p1119_p0 = por %p1118_p12, %p1117_p1 }
  0x23   : > { %p1113_p6 = pneg %p1112_p10 }
  0x25   : > { %p1120_p4 = pnand %p1119_p0, %p1113_p6 }
  0x27   : > { %1123 = shalt.err (!%p1120_p4)
}
  0x28   : > { %s1272_s25 = smov 128   ;;  %s1273_s6 = smov 8  }
  0x29   : > { %962 = dma.hbm_to_vmem [thread:$0]  (!%p1375_p11), %s1578_s1, 2048, %s1368_s7, [#allocation9], %s1272_s25, %s1272_s25, %s1273_s6  }
  0x2a   : > { %s1124_s14 = scalar_lea.hbm %s1580_s3, 2048 }
  0x2b   : > { %p1125_p1 = scmp.ne.s32.totalorder %s1580_s3, %s1124_s14  ;;  %p1131_p10 = scmp.lt.u32.totalorder %s1124_s14, %s1580_s3 }
  0x2d   : > { %p1127_p4 = pnand %p1125_p1, %p1098_p13 }
  0x2f   : > { %p1128_p6 = pneg %p1127_p4 }
  0x31   : > { %p1133_p3 = pnand %p1131_p10, %p1128_p6 }
  0x33   : > { %1136 = shalt.err (!%p1133_p3)
}
  0x34   : > { %s1137_s7 = scalar_lea.vmem %s1379_s10, 2048  ;;  %p1145_p12 = scmp.lt.s32.totalorder %s1379_s10, %s1379_s10 }
  0x35   : > { %p1138_p5 = scmp.ne.s32.totalorder %s1379_s10, %s1137_s7  ;;  %p1146_p0 = scmp.lt.s32.totalorder %s1137_s7, %s1137_s7 }
  0x37   : > { %p1140_p7 = pnand %p1138_p5, %p1098_p13  ;;  %p1147_p1 = por %p1146_p0, %p1145_p12 }
  0x39   : > { %p1141_p9 = pneg %p1140_p7 }
  0x3b   : > { %p1148_p4 = pnand %p1147_p1, %p1141_p9 }
  0x3d   : > { %1151 = shalt.err (!%p1148_p4)
}
  0x3e   : > { %s1274_s25 = smov 64   ;;  %s1275_s6 = smov 4  }
  0x3f   : > { %965 = dma.hbm_to_vmem [thread:$0]  (!%p1375_p11), %s1580_s3, 2048, %s1379_s10, [#allocation9], %s1274_s25, %s1274_s25, %s1275_s6  }
  0x40   : > { %s34_s12 = sadd.s32 1, %s1264_s22  ;;  %s41_s13 = sadd.s32 1, %s1256_s20 }
  0x41   : > { %p36_p13 = scmp.ge.s32.totalorder %s34_s12, 2  ;;  %p48_p6 = scmp.ne.s32.totalorder %s1256_s20, %s1252_s19 }
  0x42   : > { %p49_p10 = scmp.eq.s32.totalorder %s1268_s23, 0  ;;  %p976_p3 = scmp.lt.s32.totalorder %s1268_s23, 2 }
  0x43   : > { %s1606_s12 = smov (%p36_p13, %s34_s12), 0  ;;  %p1443_p7 = por %p1348_p2, %p48_p6 }
  0x44   : > { %p50_p5 = por %p49_p10, %p48_p6  ;;  %s38_s8 = ssub.s32 %s1264_s22, %s1606_s12 }
  0x45   : > { %s1593_s14 = scalar_select %p1443_p7, 1, 0 }
  0x46   : > { %s246_s15 = sand.u32 1, %s1256_s20   ;;  %p39_p9 = scmp.eq.s32.totalorder %s38_s8, 0 }
  0x47   : > { %s880_s10 = sshll.u32 %s246_s15, 3  ;;  %s881_s16 = sshll.u32 %s1264_s22, 7 }
  0x48   : > { %s1452_s17 = scalar_select %p39_p9, %s1256_s20, %s41_s13  }
  0x49   : > { %s1457_s25 = scalar_lea.hbm %s1577_s0, %s881_s16  ;;  %s250_s27 = scalar_lea.vmem [#allocation5], %s880_s10 }
  0x4a   : > { %s257_s6 = sshll.u32 %s250_s27, 4  ;;  %p1461_p2 = pnand %p976_p3, %p50_p5  ;;  %s1465_s6 = int_to_ptr.vmem [resolvable:$true] %s257_s6 }
  0x4b   : > { %s247_s11 = scalar_lea.sflag [#allocation6], %s246_s15  ;;  %s1152_s13 = scalar_lea.hbm %s1457_s25, 128 }
  0x4c   : > { %p1153_p11 = scmp.ne.s32.totalorder %s1457_s25, %s1152_s13  ;;  %p1154_p12 = pneg %p1461_p2 }
  0x4d   : > { %s1157_s16 = scalar_lea.hbm %s1577_s0, 256  ;;  %p1158_p4 = scmp.lt.u32.totalorder %s1457_s25, %s1577_s0 }
  0x4e   : > { %p1155_p0 = pnand %p1154_p12, %p1153_p11  ;;  %p1159_p13 = scmp.lt.u32.totalorder %s1157_s16, %s1152_s13 }
  0x4f   : > { %p1161_p10 = scmp.lt.u32.totalorder %s1152_s13, %s1457_s25 }
  0x50   : > { %p1156_p1 = pneg %p1155_p0  ;;  %p1160_p6 = por %p1159_p13, %p1158_p4 }
  0x52   : > { %p1162_p3 = por %p1161_p10, %p1160_p6 }
  0x54   : > { %p1163_p5 = pnand %p1162_p3, %p1156_p1 }
  0x56   : > { %1166 = shalt.err (!%p1163_p5)
}
  0x57   : > { %s1167_s15 = scalar_lea.vmem %s1465_s6, 128  ;;  %s1276_s27 = smov [#allocation5]  }
  0x58   : > { %p1168_p9 = scmp.ne.s32.totalorder %s1465_s6, %s1167_s15  ;;  %s1172_s8 = sshll.u32 %s1276_s27, 4  ;;  %s1173_s8 = int_to_ptr.vmem [resolvable:$false] %s1172_s8 }
  0x59   : > { %s1174_s10 = scalar_lea.vmem %s1173_s8, 256  ;;  %p1175_p7 = scmp.lt.s32.totalorder %s1465_s6, %s1173_s8 }
  0x5a   : > { %p1170_p11 = pnand %p1168_p9, %p1154_p12  ;;  %p1176_p4 = scmp.lt.s32.totalorder %s1174_s10, %s1167_s15 }
  0x5c   : > { %p1171_p0 = pneg %p1170_p11  ;;  %p1177_p13 = por %p1176_p4, %p1175_p7 }
  0x5e   : > { %p1178_p6 = pnand %p1177_p13, %p1171_p0 }
  0x60   : > { %1181 = shalt.err (!%p1178_p6)
}
  0x61   : > { %969 = dma.hbm_to_vmem [thread:$0]  (!%p1461_p2), %s1457_s25, 128, %s1465_s6, %s247_s11  }
  0x62   : > { %266 = sbr.rel (%p1364_p8) target bundleno = 1035 (0x40b), region = 40  ;;  %s1495_s13 = sand.u32 (!%p1364_p8), 1, %s1252_s19  }
  0x63   : > { %s883_s16 = sshll.u32 (!%p1364_p8), %s1495_s13, 3  ;;  %s269_s24 = scalar_lea.sflag (!%p1364_p8), [#allocation6], %s1495_s13 }
  0x64   : > { %s272_s7 = scalar_lea.vmem (!%p1364_p8), [#allocation5], %s883_s16  ;;  %p1595_p7 = scmp.ne.s32.totalorder (!%p1364_p8), %s1589_s28, 0 }
  0x69   : > { %1235 = dma.done.wait (%p1595_p7), %s269_s24, 128  }
  0x6a   : > { %1237 = vsyncadd (%p1595_p7), %s269_s24, 4294967168  ;;  %p1596_p2 = scmp.ne.s32.totalorder %s1587_s26, 0 }
  0x6c   : > { %1239 = dma.done.wait (%p1596_p2), [#allocation9], 4096  }
  0x6d   : > { %1241 = vsyncadd (%p1596_p2), [#allocation9], 4294963200  ;;  %v1509_v0 = vld [vmem:[%s272_s7] sm:$0xff]  ;;  %v1038_v2 = vld [vmem:[#allocation8 + $0x4] ss:$8 sps:$4 sm:$0xff]   ;;  %v1277_v18 = vmov 0  }
  0x6e   : > { %v324_v1 = vmul.f32 %v1509_v0, %v1509_v0  ;;  %v1040_v3 = vld [vmem:[#allocation8] ss:$8 sps:$4 sm:$0xff]   ;;  %475 = vmatprep.subr.bf16.mxu0 %v1038_v2  ;;  %v1041_v4 = vld [vmem:[#allocation8 + $0x14] ss:$8 sps:$4 sm:$0xff]   ;;  %v1043_v5 = vld [vmem:[#allocation8 + $0x10] ss:$8 sps:$4 sm:$0xff]   ;;  %507 = vmatprep.mubr.bf16.mxu0 %v1277_v18 }
  0x6f   : > { %476 = vmatpush1.bf16.msra.mxu0 %v1040_v3  ;;  %v1044_v6 = vld [vmem:[#allocation8 + $0x24] ss:$8 sps:$4 sm:$0xff]   ;;  %v1046_v7 = vld [vmem:[#allocation8 + $0x20] ss:$8 sps:$4 sm:$0xff]   ;;  %v1047_v8 = vld [vmem:[#allocation8 + $0x34] ss:$8 sps:$4 sm:$0xff]   ;;  %1036 = vset.pattern.permute.xlu1 %v1277_v18 }
  0x70   : > { %325 = vadd.xlane.f32.xlu0 %v324_v1  ;;  %477 = vmatprep.subr.bf16.mxu0 %v1041_v4  ;;  %v1049_v9 = vld [vmem:[#allocation8 + $0x30] ss:$8 sps:$4 sm:$0xff]   ;;  %v1050_v10 = vld [vmem:[#allocation8 + $0x44] ss:$8 sps:$4 sm:$0xff]   ;;  %v1052_v11 = vld [vmem:[#allocation8 + $0x40] ss:$8 sps:$4 sm:$0xff]  }
  0x71   : > { %v1053_v12 = vld [vmem:[#allocation8 + $0x54] ss:$8 sps:$4 sm:$0xff]   ;;  %v1055_v13 = vld [vmem:[#allocation8 + $0x50] ss:$8 sps:$4 sm:$0xff]   ;;  %v1056_v14 = vld [vmem:[#allocation8 + $0x64] ss:$8 sps:$4 sm:$0xff]   ;;  %1037 = vset.pattern.permute.xlu0 %v1277_v18 }
  0x72   : > { %v1058_v15 = vld [vmem:[#allocation8 + $0x60] ss:$8 sps:$4 sm:$0xff]   ;;  %v1059_v16 = vld [vmem:[#allocation8 + $0x74] ss:$8 sps:$4 sm:$0xff]   ;;  %v1061_v17 = vld [vmem:[#allocation8 + $0x70] ss:$8 sps:$4 sm:$0xff]  }
  0x73   : > { %478 = vmatpush1.bf16.msra.mxu0 %v1043_v5  ;;  %v1062_v19 = vld [vmem:[#allocation10 + $0x40] sm:$0xff]   ;;  %v1064_v21 = vld [vmem:[#allocation10 + $0x48] sm:$0xff]   ;;  %v1066_v23 = vld [vmem:[#allocation10 + $0x50] sm:$0xff]   ;;  %vm364_vm4 = vcmask 7168   ;;  %v1278_v4 = vmov 0.0   ;;  %v385_v5 = vlaneseq  ;;  %s922_s6 = sshll.u32 %s1260_s21, 7 }
  0x74   : > { %479 = vmatprep.subr.bf16.mxu0 %v1044_v6  ;;  %v1063_v20 = vld [vmem:[#allocation10] sm:$0xff]   ;;  %925 = vmatprep.subr.bf16.mxu1 %v1062_v19  ;;  %v1065_v22 = vld [vmem:[#allocation10 + $0x8] sm:$0xff]   ;;  %v1067_v24 = vld [vmem:[#allocation10 + $0x10] sm:$0xff]   ;;  %365 = vst.msk [vmem:[#allocation4] sm:$0xff] %vm364_vm4, %v1278_v4  ;;  %s310_s9 = scalar_lea.vmem [#allocation11], %s883_s16  ;;  %s1528_s8 = scalar_lea.hbm %s1582_s5, %s922_s6 }
  0x75   : > { %926 = vmatpush3.bf16.msra.mxu1 %v1063_v20  ;;  %v1068_v25 = vld [vmem:[#allocation10 + $0x58] sm:$0xff]   ;;  %v1070_v27 = vld [vmem:[#allocation10 + $0x60] sm:$0xff]   ;;  %v1072_v29 = vld [vmem:[#allocation10 + $0x68] sm:$0xff]   ;;  %v386_v6 = vshrl.u32 %v385_v5, 7  ;;  %s760_s11 = sshll.u32 %s310_s9, 4  ;;  %s747_s10 = scalar_lea.sflag [#allocation7], %s1495_s13  ;;  %s1530_s11 = int_to_ptr.vmem [resolvable:$true] %s760_s11 }
  0x76   : > { %927 = vmatprep.subr.bf16.mxu1 %v1064_v21  ;;  %v1069_v26 = vld [vmem:[#allocation10 + $0x18] sm:$0xff]   ;;  %v1071_v28 = vld [vmem:[#allocation10 + $0x20] sm:$0xff]   ;;  %v1073_v30 = vld [vmem:[#allocation10 + $0x28] sm:$0xff]   ;;  %s1182_s24 = scalar_lea.vmem %s1530_s11, 128  ;;  %p1597_p12 = scmp.ne.s32.totalorder %s1593_s14, 0 }
  0x77   : > { %480 = vmatpush1.bf16.msra.mxu0 %v1046_v7  ;;  %v1074_v63 = vld [vmem:[#allocation10 + $0x70] sm:$0xff]   ;;  %v1076_v2 = vld [vmem:[#allocation10 + $0x78] sm:$0xff]   ;;  %v387_v7 = vsub.s32 0, %v386_v6  ;;  %p1183_p8 = scmp.ne.s32.totalorder %s1530_s11, %s1182_s24  ;;  %s1279_s21 = smov [#allocation11]  }
  0x78   : > { %481 = vmatprep.subr.bf16.mxu0 %v1047_v8  ;;  %v1075_v1 = vld [vmem:[#allocation10 + $0x30] sm:$0xff]   ;;  %v1077_v3 = vld [vmem:[#allocation10 + $0x38] sm:$0xff]   ;;  %v391_v8 = vsub.s32 1, %v386_v6  ;;  %s1186_s16 = sshll.u32 %s1279_s21, 4  ;;  %s1187_s16 = int_to_ptr.vmem [resolvable:$false] %s1186_s16 }
  0x79   : > { %928 = vmatpush3.bf16.msra.mxu1 %v1065_v22  ;;  %p1184_p1 = pnand %p1183_p8, %p1597_p12  ;;  %s1188_s7 = scalar_lea.vmem %s1187_s16, 256 }
  0x7a   : > { %929 = vmatprep.subr.bf16.mxu1 %v1066_v23  ;;  %p1189_p3 = scmp.lt.s32.totalorder %s1530_s11, %s1187_s16  ;;  %p1190_p5 = scmp.lt.s32.totalorder %s1188_s7, %s1182_s24 }
  0x7b   : > { %482 = vmatpush1.bf16.msra.mxu0 %v1049_v9  ;;  %p1185_p10 = pneg %p1184_p1 }
  0x7c   : > { %483 = vmatprep.subr.bf16.mxu0 %v1050_v10  ;;  %p1191_p9 = por %p1190_p5, %p1189_p3 }
  0x7d   : > { %930 = vmatpush3.bf16.msra.mxu1 %v1067_v24  ;;  %v518_v24 = vld [vmem:[#allocation4] sm:$0xff] }
  0x7e   : > { %931 = vmatprep.subr.bf16.mxu1 %v1068_v25  ;;  %p1192_p11 = pnand %p1191_p9, %p1185_p10 }
  0x7f   : > { %484 = vmatpush1.bf16.msra.mxu0 %v1052_v11 }
  0x80   : > { %485 = vmatprep.subr.bf16.mxu0 %v1053_v12 }
  0x81   : > { %932 = vmatpush3.bf16.msra.mxu1 %v1069_v26 }
  0x82   : > { %933 = vmatprep.subr.bf16.mxu1 %v1070_v27 }
  0x83   : > { %486 = vmatpush1.bf16.msra.mxu0 %v1055_v13 }
  0x84   : > { %487 = vmatprep.subr.bf16.mxu0 %v1056_v14 }
  0x85   : > { %934 = vmatpush3.bf16.msra.mxu1 %v1071_v28 }
  0x86   : > { %935 = vmatprep.subr.bf16.mxu1 %v1072_v29 }
  0x87   : > { %488 = vmatpush1.bf16.msra.mxu0 %v1058_v15 }
  0x88   : > { %489 = vmatprep.subr.bf16.mxu0 %v1059_v16 }
  0x89   : > { %936 = vmatpush3.bf16.msra.mxu1 %v1073_v30 }
  0x8a   : > { %937 = vmatprep.subr.bf16.mxu1 %v1074_v63 }
  0x8b   : > { %490 = vmatpush1.bf16.msra.mxu0 %v1061_v17 }
  0x8d   : > { %938 = vmatpush3.bf16.msra.mxu1 %v1075_v1 }
  0x8e   : > { %939 = vmatprep.subr.bf16.mxu1 %v1076_v2 }
  0x91   : > { %940 = vmatpush3.bf16.msra.mxu1 %v1077_v3 }
  0xfd   : > { %v326_v31 = vpop.xlane.xlu0 %325 }
  0xfe   : > { %v327_v32 = vmax.f32 %v326_v31, 1e-24 }
 0x100   : > { %1078 = vrsqrt.f32 %v327_v32  ;;  %vm330_vm0 = vcmp.eq.f32.partialorder %v327_v32, inf  ;;  %v333_v35 = vand.u32 2147483648, %v327_v32  ;;  %vm332_vm1 = vcmp.eq.f32.partialorder %v327_v32, 0.0 }
 0x10a   : > { %v1079_v33 = vpop.eup %1078 }
 0x10b   : > { %v329_v34 = vmul.f32 %v1079_v33, %v327_v32 }
 0x10d   : > { %v331_v36 = vsel %vm330_vm0, %v327_v32, %v329_v34 }
 0x10e   : > { %v334_v37 = vsel %vm332_vm1, %v333_v35, %v331_v36 }
 0x10f   : > { %v887_v38 = vclamps-f32 %v334_v37, 0.9999999 }
 0x111   : > { %v337_v39 = vadd.f32 1.0, %v887_v38  ;;  %v346_v40 = vsub.f32 0.0, %v887_v38  ;;  %v340_v42 = vmul.f32 -0.5, %v887_v38  ;;  %v343_v47 = vand.u32 2147483647, %v887_v38 }
 0x113   : > { %1080 = vlog2.f32 %v337_v39  ;;  %v347_v41 = vadd.f32 1.0, %v346_v40  ;;  %v350_v43 = vmul.f32 -0.5, %v346_v40  ;;  %v341_v44 = vadd.f32 1.0, %v340_v42  ;;  %v920_v42 = vld [vmem:[%s1581_s4] ss:$0 sm:$0xff] }
 0x114   : > { %v353_v48 = vand.u32 2147483647, %v346_v40  ;;  %vm344_vm2 = vcmp.lt.f32.partialorder %v343_v47, 0.0004427343 }
 0x115   : > { %1082 = vlog2.f32 %v347_v41  ;;  %v351_v45 = vadd.f32 1.0, %v350_v43  ;;  %v342_v51 = vmul.f32 %v887_v38, %v341_v44 }
 0x116   : > { %1084 = vrcp.f32 %v334_v37  ;;  %vm354_vm3 = vcmp.lt.f32.partialorder %v353_v48, 0.0004427343 }
 0x117   : > { %v352_v53 = vmul.f32 %v351_v45, %v346_v40 }
 0x11d   : > { %v1081_v46 = vpop.eup %1080 }
 0x11e   : > { %v339_v49 = vmul.f32 0.6931472, %v1081_v46 }
 0x11f   : > { %v1083_v50 = vpop.eup %1082 }
 0x120   : > { %v349_v52 = vmul.f32 0.6931472, %v1083_v50  ;;  %v345_v54 = vsel %vm344_vm2, %v342_v51, %v339_v49  ;;  %v1085_v58 = vpop.eup %1084 }
 0x122   : > { %v355_v55 = vsel %vm354_vm3, %v352_v53, %v349_v52 }
 0x123   : > { %v356_v56 = vsub.f32 %v345_v54, %v355_v55 }
 0x125   : > { %v357_v57 = vmul.f32 0.5, %v356_v56 }
 0x127   : > { %v359_v59 = vmul.f32 %v1085_v58, %v357_v57 }
 0x129   : > { %v360_v60 = vmul.f32 %v359_v59, %v1509_v0  ;;  %v383_v0 = vld [vmem:[%s1579_s2] sm:$0x3] }
 0x12a   : > { %v388_v9 = vrot.slane %v383_v0, %v387_v7  ;;  %v392_v10 = vrot.slane %v383_v0, %v391_v8 }
 0x12b   : > { %v361_v61 = vpack.c.bf16 %v360_v60, %v360_v60 }
 0x12d   : > { %362 = vst [vmem:[#allocation2] sm:$0xf] %v361_v61 }
 0x134   : > { %v366_v62 = vld [vmem:[#allocation2] sm:$0xf] }
 0x135   : > { %508 = vmatmul.mubr.bf16.vlgmr.msra.gmra.mrb[0].mxu0 %v366_v62 }
 0x208   : > { %v509_v11 = vpop.f32.mrb[0].mxu0 }
 0x209   : > { %v510_v12 = vadd.f32 %v509_v11, %v388_v9  ;;  %v511_v13 = vpop.f32.mrb[1].mxu0 }
 0x20a   : > { %v512_v14 = vadd.f32 %v511_v13, %v392_v10  ;;  %v513_v15 = vpop.f32.mrb[2].mxu0 }
 0x20b   : > { %v516_v16 = vmax.f32 %v510_v12, 0.0  ;;  %v514_v17 = vpop.f32.mrb[3].mxu0 }
 0x20c   : > { %v517_v18 = vmax.f32 %v512_v14, 0.0 }
 0x20d   : > { %v519_v19 = vmul.f32 %v516_v16, %v516_v16  ;;  %v528_v22 = vpack.c.bf16 %v516_v16, %v516_v16 }
 0x20e   : > { %v520_v20 = vmul.f32 %v517_v18, %v517_v18  ;;  %v529_v21 = vpack.c.bf16 %v517_v18, %v517_v18 }
 0x210   : > { %690 = vmatprep.mubr.bf16.mxu1 %v529_v21  ;;  %v521_v23 = vadd.f32 %v520_v20, %v519_v19 }
 0x211   : > { %691 = vmatmul.mubr.bf16.vlgmr.msra.gmra.mrb[0].mxu1 %v528_v22 }
 0x212   : > { %522 = vadd.xlane.f32.xlu0 %v521_v23 }
 0x29f   : > { %v523_v25 = vpop.xlane.xlu0 %522 }
 0x2a0   : > { %v524_v26 = vadd.f32 %v523_v25, %v518_v24 }
 0x2a2   : > { %526 = vst.msk [vmem:[#allocation4] sm:$0xff] %vm364_vm4, %v524_v26 }
 0x2a9   : > { %v703_v27 = vld [vmem:[#allocation4] sm:$0xff] }
 0x2aa   : > { %v704_v28 = vmax.f32 %v703_v27, 1e-24 }
 0x2ac   : > { %1086 = vrsqrt.f32 %v704_v28  ;;  %vm707_vm5 = vcmp.eq.f32.partialorder %v704_v28, inf  ;;  %v710_v31 = vand.u32 2147483648, %v704_v28  ;;  %vm709_vm6 = vcmp.eq.f32.partialorder %v704_v28, 0.0 }
 0x2b6   : > { %v1087_v29 = vpop.eup %1086 }
 0x2b7   : > { %v706_v30 = vmul.f32 %v1087_v29, %v704_v28 }
 0x2b9   : > { %v708_v32 = vsel %vm707_vm5, %v704_v28, %v706_v30 }
 0x2ba   : > { %v711_v33 = vsel %vm709_vm6, %v710_v31, %v708_v32 }
 0x2bb   : > { %1088 = vrcp.f32 %v711_v33  ;;  %v712_v34 = vmin.f32 %v711_v33, 8.405622 }
 0x2c5   : > { %v1089_v35 = vpop.eup %1088 }
 0x2c6   : > { %v714_v36 = vmul.f32 %v1089_v35, %v712_v34 }
 0x2c8   : > { %718 = vperm.xlu1 %1036, %v714_v36  }
 0x2e4   : > { %v941_v37 = vpop.f32.mrb[0].mxu1 }
 0x2e5   : > { %v942_v38 = vpop.f32.mrb[1].mxu1 }
 0x2e6   : > { %v943_v39 = vadd.f32 %v942_v38, %v941_v37  ;;  %v944_v40 = vpop.f32.mrb[2].mxu1 }
 0x2e7   : > { %v945_v41 = vpop.f32.mrb[3].mxu1 }
 0x347   : > { %v719_v43 = vpop.permute.xlu1 %718 }
 0x348   : > { %v721_v44 = vmul.f32 %v943_v39, %v719_v43 }
 0x34a   : > { %v729_v45 = vadd.f32 %v920_v42, %v721_v44 }
 0x34c   : > { %v730_v46 = vmul.f32 %v729_v45, %v729_v45 }
 0x34e   : > { %731 = vadd.xlane.f32.xlu1 %v730_v46 }
 0x3db   : > { %v732_v47 = vpop.xlane.xlu1 %731 }
 0x3dc   : > { %v733_v48 = vmax.f32 %v732_v47, 1e-24 }
 0x3de   : > { %1090 = vrsqrt.f32 %v733_v48  ;;  %vm736_vm7 = vcmp.eq.f32.partialorder %v733_v48, inf  ;;  %v739_v51 = vand.u32 2147483648, %v733_v48  ;;  %vm738_vm8 = vcmp.eq.f32.partialorder %v733_v48, 0.0 }
 0x3e8   : > { %v1091_v49 = vpop.eup %1090 }
 0x3e9   : > { %v735_v50 = vmul.f32 %v1091_v49, %v733_v48 }
 0x3eb   : > { %v737_v52 = vsel %vm736_vm7, %v733_v48, %v735_v50 }
 0x3ec   : > { %v740_v53 = vsel %vm738_vm8, %v739_v51, %v737_v52 }
 0x3ed   : > { %1092 = vtanh.f32 %v740_v53 }
 0x3ee   : > { %1094 = vrcp.f32 %v740_v53 }
 0x3f7   : > { %v1093_v54 = vpop.eup %1092 }
 0x3f8   : > { %v1095_v55 = vpop.eup %1094 }
 0x3f9   : > { %v743_v56 = vmul.f32 %v1095_v55, %v1093_v54 }
 0x3fb   : > { %v744_v57 = vmul.f32 %v743_v56, %v729_v45 }
 0x3fd   : > { %745 = vst [vmem:[%s310_s9] sm:$0xff] %v744_v57 }
 0x3fe   : > { %1195 = shalt.err (!%p1192_p11)
}
 0x3ff   : > { %s1196_s13 = scalar_lea.hbm %s1528_s8, 128  ;;  %s1200_s30 = scalar_lea.hbm %s1582_s5, 256 }
 0x400   : > { %p1197_p0 = scmp.ne.s32.totalorder %s1528_s8, %s1196_s13  ;;  %p1201_p6 = scmp.lt.u32.totalorder %s1528_s8, %s1582_s5 }
 0x401   : > { %p1202_p7 = scmp.lt.u32.totalorder %s1200_s30, %s1196_s13  ;;  %p1204_p8 = scmp.lt.u32.totalorder %s1196_s13, %s1528_s8 }
 0x402   : > { %p1198_p4 = pnand %p1197_p0, %p1597_p12 }
 0x403   : > { %p1203_p2 = por %p1202_p7, %p1201_p6 }
 0x404   : > { %p1199_p13 = pneg %p1198_p4 }
 0x405   : > { %p1205_p1 = por %p1204_p8, %p1203_p2 }
 0x407   : > { %p1206_p10 = pnand %p1205_p1, %p1199_p13 }
 0x409   : > { %1209 = shalt.err (!%p1206_p10)
}
 0x40a   : > { %957 = dma.vmem_to_hbm [thread:$0]  (%p1597_p12), %s1530_s11, 128, %s1528_s8, %s747_s10  }
 0x40b PF: > { %s772_s9 = sand.u32 1, %s1248_s18   ;;  %p1598_p3 = scmp.ne.s32.totalorder %s1590_s29, 0 }
 0x40c   : > { %p1599_p5 = scmp.ge.s32.totalorder %s1268_s23, 2  ;;  %s773_s15 = scalar_lea.sflag [#allocation7], %s772_s9 }
 0x40e   : > { %p971_p9 = pnand %p1599_p5, %p1598_p3 }
 0x410   : > { %1243 = dma.done.wait (!%p971_p9), %s773_s15, 128  }
 0x411   : > { %1245 = vsyncadd (!%p971_p9), %s773_s15, 4294967168  ;;  %s22_s23 = sadd.s32 1, %s1268_s23   ;;  %s1600_s18 = smov %s1252_s19 }
 0x412   : > { %p19_p11 = scmp.ge.s32.totalorder %s22_s23, 4   ;;  %s1601_s19 = smov %s1256_s20 }
 0x413   : > { %s1602_s20 = smov %s1452_s17  ;;  %s1603_s21 = smov %s1264_s22 }
 0x414   : > { %s1604_s22 = smov %s1606_s12  ;;  %21 = sbr.rel (!%p19_p11) target bundleno = 7 (0x7), region = 106 }
 0x41b   :  { %778 = vsyncpa [#allocation6], 1 }
 0x41c   :  { %780 = vsyncpa [#allocation6 + $0x1], 1 }
 0x41d   :  { %781 = vsyncpa [#allocation9], 1 }
 0x41e   :  { %782 = vsyncpa [#allocation7], 1 }
 0x41f   :  { %784 = vsyncpa [#allocation7 + $0x1], 1 }

</bundles_post_ra>
